<compile_context>
chip_gen: v7x
topology: tpu7x:2x2x1
jax: 0.10.0
libtpu: 0.0.40
codegen_flags: <defaults>
</compile_context>

<pallas_src>
import math

import jax
import jax.numpy as jnp
from jax.experimental import pallas as pl
from jax.experimental.pallas import tpu as pltpu


def time_embedding_kernel(x_ref, w_ref, ws_ref, wc_ref, pb_ref, o_ref):
    # x_ref : (tb, 1)     timestep block
    # w_ref : (1, D/2)    Gaussian Fourier frequencies, pre-scaled by 2*pi
    # ws_ref: (D/2, D)    pre-transposed "sin" half of the projection weight
    # wc_ref: (D/2, D)    pre-transposed "cos" half of the projection weight
    # pb_ref: (1, D)      projection bias
    # o_ref : (tb, D)     output embedding block
    x_proj = x_ref[...] * w_ref[...]            # (tb, D/2) broadcast multiply (VPU)
    s = jnp.sin(x_proj)                         # EUP
    c = jnp.cos(x_proj)                         # EUP

    # Two MXU-native contractions; no per-step slicing or transposed RHS.
    acc = jnp.dot(s, ws_ref[...], preferred_element_type=jnp.float32)
    acc = acc + jnp.dot(c, wc_ref[...], preferred_element_type=jnp.float32)
    o_ref[...] = (acc + pb_ref[...]).astype(o_ref.dtype)


def prepare_time_embedding_params(W, proj_weight, proj_bias):
    """One-time parameter relayout (do this at init, NOT per call).

    W:           (D/2,)  Fourier frequencies
    proj_weight: (D, D)  torch (out, in) Linear weight
    proj_bias:   (D,)
    Returns (w2, w_sin, w_cos, pb) ready for `time_embedding`.
    """
    half = W.shape[0]
    D = 2 * half
    assert proj_weight.shape == (D, D) and proj_bias.shape == (D,)
    w2 = (W.astype(jnp.float32) * (2.0 * math.pi)).reshape(1, half)
    # out[b, o] = sum_i sin_i * pw[o, i] + sum_i cos_i * pw[o, half + i]
    w_sin = jnp.transpose(proj_weight[:, :half]).astype(jnp.float32)   # (D/2, D)
    w_cos = jnp.transpose(proj_weight[:, half:]).astype(jnp.float32)   # (D/2, D)
    pb = proj_bias.reshape(1, D).astype(jnp.float32)
    return w2, w_sin, w_cos, pb


def _pick_batch_tile(B, max_tile=4096):
    """Batch-tile policy: big tiles, >=2 evenly-dividing blocks once B is large."""
    if B <= 512 or B % 8 != 0:
        return B                         # single block; overhead-bound regime
    cap = min(max_tile, B // 2)          # guarantees at least 2 blocks (v7x megacore)
    tb = (cap // 8) * 8
    while tb >= 8 and B % tb != 0:       # avoid a partial/masked last block
        tb -= 8
    return tb if tb >= 8 else B


def time_embedding(x, w2, w_sin, w_cos, pb, out_dtype=jnp.float32):
    """x: (B,) timesteps; remaining args come from prepare_time_embedding_params."""
    B = x.shape[0]
    half = w2.shape[1]
    D = 2 * half

    x2 = x.reshape(B, 1).astype(jnp.float32)

    tb = _pick_batch_tile(B)
    grid = (pl.cdiv(B, tb),)

    return pl.pallas_call(
        time_embedding_kernel,
        out_shape=jax.ShapeDtypeStruct((B, D), out_dtype),
        grid=grid,
        in_specs=[
            pl.BlockSpec((tb, 1), lambda i: (i, 0)),
            pl.BlockSpec((1, half), lambda i: (0, 0)),    # resident across grid
            pl.BlockSpec((half, D), lambda i: (0, 0)),    # w_sin resident
            pl.BlockSpec((half, D), lambda i: (0, 0)),    # w_cos resident
            pl.BlockSpec((1, D), lambda i: (0, 0)),       # bias resident
        ],
        out_specs=pl.BlockSpec((tb, D), lambda i: (i, 0)),
        compiler_params=pltpu.CompilerParams(
            dimension_semantics=("parallel",),
        ),
    )(x2, w2, w_sin, w_cos, pb)


def reference(x, W, proj_weight, proj_bias):
    x_proj = x[:, None] * W[None, :] * 2.0 * math.pi
    feat = jnp.concatenate([jnp.sin(x_proj), jnp.cos(x_proj)], axis=-1)
    return feat @ proj_weight.T + proj_bias


if __name__ == "__main__":
    key = jax.random.PRNGKey(0)
    k_x, k_w, k_pw, k_pb = jax.random.split(key, 4)

    B = 8
    time_dim = 32
    scale = 30.0

    # Deterministic parameter init (synthetic, matches __init__ shapes).
    W = jax.random.normal(k_w, (time_dim // 2,), dtype=jnp.float32) * scale
    bound = 1.0 / math.sqrt(time_dim)  # PyTorch Linear default init range
    proj_weight = jax.random.uniform(
        k_pw, (time_dim, time_dim), minval=-bound, maxval=bound, dtype=jnp.float32
    )
    proj_bias = jax.random.uniform(
        k_pb, (time_dim,), minval=-bound, maxval=bound, dtype=jnp.float32
    )

    # Example timesteps in [0, 1).
    x = jax.random.uniform(k_x, (B,), dtype=jnp.float32)

    # One-time parameter relayout (would live at module init in a real model).
    w2, w_sin, w_cos, pb = prepare_time_embedding_params(W, proj_weight, proj_bias)

    out = time_embedding(x, w2, w_sin, w_cos, pb)
    out = jax.block_until_ready(out)

    ref = reference(x, W, proj_weight, proj_bias)
    assert out.shape == (B, time_dim)
    assert jnp.allclose(out, ref, atol=1e-4, rtol=1e-4), "mismatch vs reference"

    print("KERNEL_OK")
</pallas_src>

<mosaic_0001>
module attributes {stable_mosaic.version = 11 : i64} {
  func.func @time_embedding_kernel(%arg0: i32, %arg1: memref<8x1xf32, #tpu.memory_space<vmem>>, %arg2: memref<1x16xf32, #tpu.memory_space<vmem>>, %arg3: memref<16x32xf32, #tpu.memory_space<vmem>>, %arg4: memref<16x32xf32, #tpu.memory_space<vmem>>, %arg5: memref<1x32xf32, #tpu.memory_space<vmem>>, %arg6: memref<8x32xf32, #tpu.memory_space<vmem>>) attributes {dimension_semantics = [#tpu.dimension_semantics<parallel>], iteration_bounds = array<i64: 1>, scalar_prefetch = 0 : i64, scratch_operands = 0 : i64, tpu.core_type = #tpu.core_type<tc>, window_params = [{transform_indices = @transform_0, window_bounds = array<i64: 8, 1>}, {pipeline_mode = #tpu.pipeline_mode<synchronous>, transform_indices = @transform_1, window_bounds = array<i64: 1, 16>}, {pipeline_mode = #tpu.pipeline_mode<synchronous>, transform_indices = @transform_2, window_bounds = array<i64: 16, 32>}, {pipeline_mode = #tpu.pipeline_mode<synchronous>, transform_indices = @transform_3, window_bounds = array<i64: 16, 32>}, {pipeline_mode = #tpu.pipeline_mode<synchronous>, transform_indices = @transform_4, window_bounds = array<i64: 1, 32>}, {transform_indices = @transform_5, window_bounds = array<i64: 8, 32>}]} {
    %c0 = arith.constant 0 : index
    %c0_0 = arith.constant 0 : index
    %0 = vector.load %arg1[%c0, %c0_0] : memref<8x1xf32, #tpu.memory_space<vmem>>, vector<8x1xf32>
    %c0_1 = arith.constant 0 : index
    %c0_2 = arith.constant 0 : index
    %1 = vector.load %arg2[%c0_1, %c0_2] : memref<1x16xf32, #tpu.memory_space<vmem>>, vector<1x16xf32>
    %2 = vector.broadcast %0 : vector<8x1xf32> to vector<8x16xf32>
    %3 = vector.broadcast %1 : vector<1x16xf32> to vector<8x16xf32>
    %4 = arith.mulf %2, %3 : vector<8x16xf32>
    %5 = math.sin %4 : vector<8x16xf32>
    %6 = math.cos %4 : vector<8x16xf32>
    %c0_3 = arith.constant 0 : index
    %c0_4 = arith.constant 0 : index
    %7 = vector.load %arg3[%c0_3, %c0_4] : memref<16x32xf32, #tpu.memory_space<vmem>>, vector<16x32xf32>
    %cst = arith.constant dense<0.000000e+00> : vector<8x32xf32>
    %8 = tpu.matmul %5, %7, %cst {dimension_numbers = #tpu.dot_dimension_numbers<[1], [0], [0], [1], [0, 0, 1, 1], [], []>} : vector<8x16xf32>, vector<16x32xf32>, vector<8x32xf32> -> vector<8x32xf32>
    %c0_5 = arith.constant 0 : index
    %c0_6 = arith.constant 0 : index
    %9 = vector.load %arg4[%c0_5, %c0_6] : memref<16x32xf32, #tpu.memory_space<vmem>>, vector<16x32xf32>
    %cst_7 = arith.constant dense<0.000000e+00> : vector<8x32xf32>
    %10 = tpu.matmul %6, %9, %cst_7 {dimension_numbers = #tpu.dot_dimension_numbers<[1], [0], [0], [1], [0, 0, 1, 1], [], []>} : vector<8x16xf32>, vector<16x32xf32>, vector<8x32xf32> -> vector<8x32xf32>
    %11 = arith.addf %8, %10 : vector<8x32xf32>
    %c0_8 = arith.constant 0 : index
    %c0_9 = arith.constant 0 : index
    %12 = vector.load %arg5[%c0_8, %c0_9] : memref<1x32xf32, #tpu.memory_space<vmem>>, vector<1x32xf32>
    %13 = vector.broadcast %12 : vector<1x32xf32> to vector<8x32xf32>
    %14 = arith.addf %11, %13 : vector<8x32xf32>
    %c0_10 = arith.constant 0 : index
    %c0_11 = arith.constant 0 : index
    %15 = vector.load %arg6[%c0_10, %c0_11] : memref<8x32xf32, #tpu.memory_space<vmem>>, vector<8x32xf32>
    tpu.vector_store %arg6[%c0_10, %c0_11], %14 {strides = array<i32>} : memref<8x32xf32, #tpu.memory_space<vmem>>, vector<8x32xf32>,
    return
  }
  func.func @transform_0(%arg0: i32) -> (i32, i32) {
    %c0_i32 = arith.constant 0 : i32
    %c0_i32_0 = arith.constant 0 : i32
    return %arg0, %c0_i32 : i32, i32
  }
  func.func @transform_1(%arg0: i32) -> (i32, i32) {
    %c0_i32 = arith.constant 0 : i32
    %c0_i32_0 = arith.constant 0 : i32
    %c0_i32_1 = arith.constant 0 : i32
    return %c0_i32, %c0_i32_0 : i32, i32
  }
  func.func @transform_2(%arg0: i32) -> (i32, i32) {
    %c0_i32 = arith.constant 0 : i32
    %c0_i32_0 = arith.constant 0 : i32
    %c0_i32_1 = arith.constant 0 : i32
    return %c0_i32, %c0_i32_0 : i32, i32
  }
  func.func @transform_3(%arg0: i32) -> (i32, i32) {
    %c0_i32 = arith.constant 0 : i32
    %c0_i32_0 = arith.constant 0 : i32
    %c0_i32_1 = arith.constant 0 : i32
    return %c0_i32, %c0_i32_0 : i32, i32
  }
  func.func @transform_4(%arg0: i32) -> (i32, i32) {
    %c0_i32 = arith.constant 0 : i32
    %c0_i32_0 = arith.constant 0 : i32
    %c0_i32_1 = arith.constant 0 : i32
    return %c0_i32, %c0_i32_0 : i32, i32
  }
  func.func @transform_5(%arg0: i32) -> (i32, i32) {
    %c0_i32 = arith.constant 0 : i32
    %c0_i32_0 = arith.constant 0 : i32
    return %arg0, %c0_i32 : i32, i32
  }
}

</mosaic_0001>

<bundles_post_ra>
// kernel: tpu_custom_call.1
= control target key start
LH: loop header
LB: loop body
LE: loop exit
PB: predicated region body
PF: predicated region fallthrough
CT: control target
= control target key end

     0   :  { %10 = vsyncpa [#allocation3], 0  ;;  %s702_s0 = inlined_call_operand.vmem [shape: f32[8,1], index: 0, kind: input, shape index: {}]   ;;  %s703_s1 = inlined_call_operand.hbm [shape: f32[1,16], index: 1, kind: input, shape index: {}]   ;;  %s704_s2 = inlined_call_operand.vmem [shape: f32[16,32], index: 2, kind: input, shape index: {}]   ;;  %s705_s3 = inlined_call_operand.hbm [shape: f32[16,32], index: 3, kind: input, shape index: {}]   ;;  %s706_s4 = inlined_call_operand.vmem [shape: f32[1,32], index: 4, kind: input, shape index: {}]   ;;  %s707_s5 = inlined_call_operand.hbm [shape: f32[8,32], index: 5, kind: output, shape index: {}]  }
   0x1   :  { %11 = vsyncpa [#allocation6], 0 }
   0x2   :  { %12 = vsyncpa [#allocation4], 0  ;;  %s579_s18 = smov [#allocation2]   ;;  %s580_s20 = smov [#allocation5]  }
   0x3   :  { %s21_s19 = sshll.u32 %s579_s18, 4  ;;  %s32_s21 = sshll.u32 %s580_s20, 4  ;;  %s22_s19 = int_to_ptr.vmem [resolvable:$true] %s21_s19  ;;  %s624_s21 = int_to_ptr.vmem [resolvable:$true] %s32_s21 }
   0x4   :  { %s507_s24 = scalar_lea.hbm %s703_s1, 16 }
   0x5   :  { %p508_p0 = scmp.ne.s32.totalorder %s703_s1, %s507_s24  ;;  %p511_p1 = scmp.lt.u32.totalorder %s507_s24, %s703_s1 }
   0x7   :  { %p513_p2 = pnand %p511_p1, %p508_p0 }
   0x9   :  { %516 = shalt.err (!%p513_p2)
}
   0xa   :  { %s517_s29 = scalar_lea.vmem %s22_s19, 16  ;;  %s521_s30 = scalar_lea.vmem %s22_s19, 32 }
   0xb   :  { %p518_p3 = scmp.ne.s32.totalorder %s22_s19, %s517_s29  ;;  %p522_p4 = scmp.lt.s32.totalorder %s22_s19, %s22_s19 }
   0xc   :  { %p523_p5 = scmp.lt.s32.totalorder %s521_s30, %s517_s29 }
   0xe   :  { %p524_p6 = por %p523_p5, %p522_p4 }
  0x10   :  { %p525_p7 = pnand %p524_p6, %p518_p3 }
  0x12   :  { %528 = shalt.err (!%p525_p7)
}
  0x13   :  { %24 = dma.hbm_to_vmem [thread:$0]  %s703_s1, 16, %s22_s19, [#allocation3]  }
  0x14   :  { %s529_s10 = scalar_lea.hbm %s705_s3, 256 }
  0x15   :  { %p530_p8 = scmp.ne.s32.totalorder %s705_s3, %s529_s10  ;;  %p533_p9 = scmp.lt.u32.totalorder %s529_s10, %s705_s3 }
  0x17   :  { %p535_p10 = pnand %p533_p9, %p530_p8 }
  0x19   :  { %538 = shalt.err (!%p535_p10)
}
  0x1a   :  { %s539_s15 = scalar_lea.vmem %s624_s21, 256  ;;  %p544_p12 = scmp.lt.s32.totalorder %s624_s21, %s624_s21 }
  0x1b   :  { %p540_p11 = scmp.ne.s32.totalorder %s624_s21, %s539_s15  ;;  %p545_p13 = scmp.lt.s32.totalorder %s539_s15, %s539_s15 }
  0x1d   :  { %p546_p0 = por %p545_p13, %p544_p12 }
  0x1f   :  { %p547_p1 = pnand %p546_p0, %p540_p11 }
  0x21   :  { %550 = shalt.err (!%p547_p1)
}
  0x22   :  { %s581_s1 = smov 128   ;;  %s582_s16 = smov 8  }
  0x23   :  { %38 = dma.hbm_to_vmem [thread:$0]  %s705_s3, 256, %s624_s21, [#allocation6], %s581_s1, %s581_s1, %s582_s16  }
  0x24   :  { %573 = dma.done.wait [#allocation3], 16  }
  0x25   :  { %574 = vsyncadd [#allocation3], 4294967280 }
  0x26   :  { %575 = dma.done.wait [#allocation6], 256  }
  0x27   :  { %576 = vsyncadd [#allocation6], 4294967040  ;;  %v583_v0 = vmov 0   ;;  %v47_v1 = vld [vmem:[%s702_s0] sm:$0xff]  ;;  %v270_v2 = vld [vmem:[#allocation5] sm:$0xff]  ;;  %v584_v5 = vmov 0.0|0.0  }
  0x28   :  { %502 = vset.pattern.permute.xlu0 %v583_v0  ;;  %v271_v3 = vld [vmem:[#allocation5 + $0x8] sm:$0xff]  ;;  %477 = vmatprep.subr.bf16.mxu0 %v584_v5  ;;  %v269_v7 = vld [vmem:[%s704_s2 + $0x8] sm:$0xff]  ;;  %vm585_vm0 = vmmov 0   ;;  %v586_v9 = vmov 0.0   ;;  %v445_v10 = vld [vmem:[#allocation2] ss:$0 sm:$0xff] }
  0x29   :  { %51 = vperm.xlu0 %502, %v47_v1   ;;  %v268_v4 = vld [vmem:[%s704_s2] sm:$0xff]  ;;  %480 = vmatprep.subr.bf16.mxu1 %v584_v5  ;;  %v478_v6 = vpack.c.bf16 %v271_v3, %v270_v2  ;;  %v587_v23 = vmov 683565275   ;;  %v588_v25 = vmov 2475754826   ;;  %vm272_vm11 = vcmask 130048  }
  0x2a   :  { %v481_v8 = vpack.c.bf16 %v269_v7, %v268_v4  ;;  %467 = vmatprep.mubr.msk.f32.mxu0 %vm585_vm0, %v586_v9  ;;  %474 = vmatprep.mubr.msk.f32.mxu1 %vm585_vm0, %v586_v9  ;;  %v589_v28 = vmov 2131351028   ;;  %v590_v31 = vmov 2102212464   ;;  %v591_v34 = vmov 920167782  }
  0x2b   :  { %479 = vmatpush3.bf16.msra.mxu0 %v478_v6  ;;  %v592_v37 = vmov 1326507024   ;;  %s593_s24 = smov [#allocation7]  }
  0x2c   :  { %482 = vmatpush3.bf16.msra.mxu1 %v481_v8  ;;  %s435_s25 = sshll.u32 %s593_s24, 4  ;;  %s436_s25 = int_to_ptr.vmem [resolvable:$true] %s435_s25 }
  0x2d   :  { %s551_s26 = scalar_lea.vmem %s436_s25, 128  ;;  %p556_p3 = scmp.lt.s32.totalorder %s436_s25, %s436_s25 }
  0x2e   :  { %p552_p2 = scmp.ne.s32.totalorder %s436_s25, %s551_s26  ;;  %p557_p4 = scmp.lt.s32.totalorder %s551_s26, %s551_s26 }
  0x30   :  { %p558_p5 = por %p557_p4, %p556_p3 }
  0x32   :  { %p559_p6 = pnand %p558_p5, %p552_p2 }
  0xa8   :  { %v52_v11 = vpop.permute.xlu0 %51 }
  0xa9   :  { %v664_v12 = vmul.f32 %v445_v10, %v52_v11 }
  0xab   :  { %v64_v13 = vand.u32 2139095040, %v664_v12  ;;  %v61_v17 = vand.u32 2147483647, %v664_v12  ;;  %vm63_vm8 = vcmp.lt.s32.totalorder %v664_v12, 0 }
  0xad   :  { %v65_v14 = vshrl.u32 %v64_v13, 23  ;;  %v68_v20 = vand.u32 8388607, %v61_v17  ;;  %vm62_vm9 = vcmp.le.f32.partialorder %v61_v17, 0.7853982 }
  0xaf   :  { %v446_v15 = vadd.s32 4294967169, %v65_v14  ;;  %v69_v39 = vor.u32 8388608, %v68_v20 }
  0xb1   :  { %v71_v16 = vadd.s32 1, %v446_v15  ;;  %v109_v53 = vshll.u32 %v69_v39, 8 }
  0xb3   :  { %vm72_vm1 = vcmp.gt.s32.totalorder %v71_v16, 0 }
  0xb4   :  { %v73_v18 = vsel %vm72_vm1, %v71_v16, 0  ;;  %vm153_vm1 = vweird.f32 %v664_v12 }
  0xb5   :  { %v75_v19 = vand.u32 31, %v73_v18  ;;  %v74_v22 = vshrl.u32 %v73_v18, 5 }
  0xb7   :  { %v76_v21 = vsub.s32 32, %v75_v19  ;;  %v78_v24 = vshll.u32 %v587_v23, %v75_v19  ;;  %v81_v26 = vshll.u32 %v588_v25, %v75_v19  ;;  %v84_v30 = vshll.u32 %v589_v28, %v75_v19 }
  0xb8   :  { %v87_v33 = vshll.u32 %v590_v31, %v75_v19  ;;  %v90_v36 = vshll.u32 %v591_v34, %v75_v19  ;;  %vm93_vm2 = vcmp.lt.s32.totalorder %v74_v22, 1  ;;  %vm96_vm3 = vcmp.lt.s32.totalorder %v74_v22, 4 }
  0xb9   :  { %v79_v27 = vshrl.u32 %v588_v25, %v76_v21  ;;  %v82_v29 = vshrl.u32 %v589_v28, %v76_v21  ;;  %v85_v32 = vshrl.u32 %v590_v31, %v76_v21  ;;  %v88_v35 = vshrl.u32 %v591_v34, %v76_v21 }
  0xba   :  { %v91_v38 = vshrl.u32 %v592_v37, %v76_v21  ;;  %v77_v48 = vshrl.u32 %v587_v23, %v76_v21  ;;  %vm95_vm4 = vcmp.lt.s32.totalorder %v74_v22, 3  ;;  %vm94_vm5 = vcmp.lt.s32.totalorder %v74_v22, 2 }
  0xbb   :  { %v80_v40 = vor.u32 %v79_v27, %v78_v24  ;;  %v83_v41 = vor.u32 %v82_v29, %v81_v26  ;;  %v86_v42 = vor.u32 %v85_v32, %v84_v30  ;;  %v89_v43 = vor.u32 %v88_v35, %v87_v33 }
  0xbc   :  { %v92_v44 = vor.u32 %v91_v38, %v90_v36 }
  0xbd   :  { %v98_v45 = vsel %vm96_vm3, %v86_v42, 2102212464  ;;  %v101_v46 = vsel %vm93_vm2, %v80_v40, %v83_v41  ;;  %v105_v47 = vsel %vm93_vm2, %v83_v41, %v86_v42  ;;  %v102_v49 = vsel %vm96_vm3, %v89_v43, 920167782 }
  0xbe   :  { %v106_v50 = vsel %vm96_vm3, %v92_v44, 1326507024  ;;  %v103_v51 = vsel %vm95_vm4, %v86_v42, %v102_v49  ;;  %v97_v54 = vsel %vm93_vm2, %v77_v48, %v80_v40  ;;  %v99_v55 = vsel %vm95_vm4, %v83_v41, %v98_v45  ;;  %v456_v48 = vld [vmem:[%s706_s4] ss:$0 sm:$0xff] }
  0xbf   :  { %v107_v52 = vsel %vm95_vm4, %v89_v43, %v106_v50  ;;  %v104_v56 = vsel %vm94_vm5, %v101_v46, %v103_v51  ;;  %v100_v62 = vsel %vm94_vm5, %v97_v54, %v99_v55  ;;  %vm427_vm2 = vcmask 261120  }
  0xc0   :  { %v108_v57 = vsel %vm94_vm5, %v105_v47, %v107_v52  ;;  %v673_v60 = vmul.u32.u64.low %v109_v53, %v104_v56  ;;  %v674_v61 = vmul.u32.u64.high %v109_v53, %v104_v56, %v673_v60  ;;  %v116_v0 = vmul.u32 %v109_v53, %v100_v62 }
  0xc1   :  { %v670_v58 = vmul.u32.u64.low %v109_v53, %v108_v57  ;;  %v671_v59 = vmul.u32.u64.high %v109_v53, %v108_v57, %v670_v58 }
  0xc2   :  { %v119_v63 = vadd.s32 1, %v674_v61 }
  0xc3   :  { %vm118_vm6 = vc.u32 %v671_v59, %v673_v60  ;;  %v117_v13 = vadd.s32 %v673_v60, %v671_v59 }
  0xc4   :  { %v120_v1 = vsel %vm118_vm6, %v119_v63, %v674_v61 }
  0xc5   :  { %v121_v2 = vadd.s32 %v120_v1, %v116_v0 }
  0xc7   :  { %v122_v3 = vadd.s32 536870912, %v121_v2 }
  0xc9   :  { %v123_v4 = vshrl.u32 %v122_v3, 30 }
  0xcb   :  { %v124_v5 = vshll.u32 %v123_v4, 30  ;;  %v147_v26 = vsub.s32 4, %v123_v4 }
  0xcd   :  { %v125_v6 = vsub.s32 %v121_v2, %v124_v5  ;;  %v148_v29 = vsel %vm63_vm8, %v147_v26, %v123_v4 }
  0xce   :  { %v150_v31 = vsel %vm62_vm9, 0, %v148_v29 }
  0xcf   :  { %v127_v7 = vsub.s32 0, %v125_v6  ;;  %v154_v32 = vadd.s32 3, %v150_v31  ;;  %v258_v33 = vand.u32 3, %v150_v31 }
  0xd1   :  { %v447_v8 = vmin.u32 %v127_v7, %v125_v6  ;;  %v155_v34 = vand.u32 3, %v154_v32  ;;  %vm263_vm10 = vcmp.eq.s32.totalorder %v258_v33, 2  ;;  %vm260_vm13 = vcmp.eq.s32.totalorder %v258_v33, 0 }
  0xd2   :  { %vm259_vm15 = vcmp.lt.s32.totalorder %v258_v33, 2 }
  0xd3   :  { %v129_v9 = vclz %v447_v8  ;;  %vm160_vm12 = vcmp.eq.s32.totalorder %v155_v34, 2  ;;  %vm157_vm14 = vcmp.eq.s32.totalorder %v155_v34, 0  ;;  %vm156_vm0 = vcmp.lt.s32.totalorder %v155_v34, 2 }
  0xd5   :  { %v448_v10 = vadd.s32 4294967294, %v129_v9 }
  0xd7   :  { %vm449_vm7 = vcmp.lt.s32.totalorder %v448_v10, 0 }
  0xd8   :  { %v132_v11 = vsel %vm449_vm7, 0, %v448_v10 }
  0xd9   :  { %v133_v14 = vsub.s32 32, %v132_v11  ;;  %v137_v15 = vsub.s32 4294967266, %v132_v11  ;;  %v134_v16 = vshll.u32 %v125_v6, %v132_v11 }
  0xdb   :  { %v135_v18 = vshrl.u32 %v117_v13, %v133_v14  ;;  %v138_v19 = vadd.s32 127, %v137_v15 }
  0xdd   :  { %v136_v20 = vor.u32 %v135_v18, %v134_v16  ;;  %v139_v21 = vshll.u32 %v138_v19, 23 }
  0xdf   :  { %v140_v22 = vor.u32 4788187, %v139_v21  ;;  %v143_v24 = vcvt.s32.f32 %v136_v20 }
  0xe1   :  { %v141_v23 = vand.u32 2147483647, %v140_v22 }
  0xe3   :  { %v144_v25 = vmul.f32 %v143_v24, %v141_v23 }
  0xe5   :  { %v145_v27 = vxor.u32 2147483648, %v144_v25 }
  0xe7   :  { %v146_v28 = vsel %vm63_vm8, %v145_v27, %v144_v25 }
  0xe8   :  { %v149_v30 = vsel %vm62_vm9, %v664_v12, %v146_v28 }
  0xe9   :  { %503 = vcosq.f32 %v149_v30 }
  0xea   :  { %505 = vsinq.f32 %v149_v30 }
  0xf3   :  { %v504_v35 = vpop.eup %503 }
  0xf4   :  { %v506_v36 = vpop.eup %505  ;;  %v161_v37 = vxor.u32 2147483648, %v504_v35 }
  0xf5   :  { %v158_v38 = vxor.u32 2147483648, %v506_v36 }
  0xf6   :  { %v265_v39 = vsel %vm263_vm10, %v161_v37, %v506_v36  ;;  %v162_v17 = vsel %vm160_vm12, %v161_v37, %v506_v36 }
  0xf7   :  { %v262_v40 = vsel %vm260_vm13, %v504_v35, %v158_v38  ;;  %v159_v41 = vsel %vm157_vm14, %v504_v35, %v158_v38 }
  0xf8   :  { %v266_v42 = vsel %vm259_vm15, %v262_v40, %v265_v39  ;;  %v163_v43 = vsel %vm156_vm0, %v159_v41, %v162_v17 }
  0xf9   :  { %v267_v44 = vsel %vm153_vm1, nan, %v266_v42  ;;  %v164_v45 = vsel %vm153_vm1, nan, %v163_v43 }
  0xfa   :  { %468 = vmatmul.mubr.msk.f32.vlgmr.msra.gmra.mrb[0].mxu0 %vm272_vm11, %v267_v44  ;;  %475 = vmatmul.mubr.msk.f32.vlgmr.msra.gmra.mrb[0].mxu1 %vm272_vm11, %v164_v45 }
 0x1cd   :  { %v342_v46 = vpop.f32.mrb[0].mxu0  ;;  %v415_v47 = vpop.f32.mrb[0].mxu1 }
 0x1ce   :  { %v416_v49 = vadd.f32 %v415_v47, %v342_v46  ;;  %v469_v50 = vpop.f32.mrb[1].mxu0  ;;  %v476_v51 = vpop.f32.mrb[1].mxu1 }
 0x1d0   :  { %v426_v12 = vadd.f32 %v456_v48, %v416_v49 }
 0x1d2   :  { %428 = vst.msk [vmem:[#allocation7] sm:$0xff] %vm427_vm2, %v426_v12 }
 0x1d3   :  { %562 = shalt.err (!%p559_p6)
}
 0x1d4   :  { %s563_s4 = scalar_lea.hbm %s707_s5, 128 }
 0x1d5   :  { %p564_p7 = scmp.ne.s32.totalorder %s707_s5, %s563_s4  ;;  %p567_p8 = scmp.lt.u32.totalorder %s563_s4, %s707_s5 }
 0x1d7   :  { %p569_p9 = pnand %p567_p8, %p564_p7 }
 0x1d9   :  { %572 = shalt.err (!%p569_p9)
}
 0x1da   :  { %438 = dma.vmem_to_hbm [thread:$0]  %s436_s25, 128, %s707_s5, [#allocation4]  }
 0x1db   :  { %577 = dma.done.wait [#allocation4], 128  }
 0x1dc   :  { %578 = vsyncadd [#allocation4], 4294967168 }
 0x1dd   :  { %442 = vsyncpa [#allocation3], 1 }
 0x1de   :  { %443 = vsyncpa [#allocation6], 1 }
 0x1df   :  { %444 = vsyncpa [#allocation4], 1 }

</bundles_post_ra>
